<compile_context>
chip_gen: v6e
topology: v6e:2x2x1
jax: 0.10.0
libtpu: 0.0.40
codegen_flags: <defaults>
</compile_context>

<pallas_src>
import functools

import jax
import jax.numpy as jnp
from jax.experimental import pallas as pl
from jax.experimental.pallas import tpu as pltpu

LANE = 128     # lane width: last dims padded to multiples of 128 (256 viable on v6e/v7x at scale)
SUBLANE = 8    # sublane width: second-to-last dims padded to multiples of 8


def _round_up(n, m):
    return ((n + m - 1) // m) * m


def _pad_to(arr, shape):
    pads = [(0, t - s) for s, t in zip(arr.shape, shape)]
    if all(p == (0, 0) for p in pads):
        return arr
    return jnp.pad(arr, pads)


# --------------------------------------------------------------------------- #
# Kernel
# --------------------------------------------------------------------------- #
def fnn_kernel(x_ref,
               w1_ref, b1_ref,
               w2_ref, b2_ref,
               w3_ref, b3_ref,
               w4_ref, b4_ref,
               out_ref):
    # MXU operand dtype comes from how the weights were prepared (f32 or bf16);
    # accumulation is always f32; bias-add + ReLU stay f32 (VPU filler under MXU).
    cdt = w1_ref.dtype

    h = jnp.dot(x_ref[...].astype(cdt), w1_ref[...],
                preferred_element_type=jnp.float32)
    h = jnp.maximum(h + b1_ref[...], 0.0)           # fc1 + relu1
    h = jnp.dot(h.astype(cdt), w2_ref[...],
                preferred_element_type=jnp.float32)
    h = jnp.maximum(h + b2_ref[...], 0.0)           # fc2 + relu2
    h = jnp.dot(h.astype(cdt), w3_ref[...],
                preferred_element_type=jnp.float32)
    h = jnp.maximum(h + b3_ref[...], 0.0)           # fc3 + relu3
    h = jnp.dot(h.astype(cdt), w4_ref[...],
                preferred_element_type=jnp.float32)
    out_ref[...] = (h + b4_ref[...]).astype(out_ref.dtype)   # fc4 (no activation)


# --------------------------------------------------------------------------- #
# One-time parameter preparation (outside the per-call path)
# --------------------------------------------------------------------------- #
def prepare_fnn_params(params, *, compute_dtype=jnp.float32, lane=LANE):
    """Zero-pad every feature dim to a multiple of `lane` and cast weights.

    params: [(W1, b1), ..., (W4, b4)] with W: (in, out) f32, b: (1, out) f32.
    Returns a flat tuple (w1, b1, ..., w4, b4).  Weights are stored in
    `compute_dtype` (bf16 = v6e/v7x MXU fast path, halves weight VMEM/HBM
    traffic); biases stay f32.  Zero-padded rows/cols + zero bias keep padded
    lanes at exactly 0 through ReLU, so results are unchanged.
    """
    out = []
    for W, b in params:
        k_p = _round_up(W.shape[0], lane)
        n_p = _round_up(W.shape[1], lane)
        out.append(_pad_to(W, (k_p, n_p)).astype(compute_dtype))
        out.append(_pad_to(b.reshape(1, -1), (1, n_p)).astype(jnp.float32))
    return tuple(out)


# --------------------------------------------------------------------------- #
# Forward
# --------------------------------------------------------------------------- #
@functools.partial(jax.jit,
                   static_argnames=("out_size", "block_m", "stream_buffers"))
def fnn_forward(x, padded_params, *, out_size, block_m=256, stream_buffers=2):
    """x: (B, input_size) f32.  padded_params: output of prepare_fnn_params."""
    w1, b1, w2, b2, w3, b3, w4, b4 = padded_params
    in_p = w1.shape[0]
    h1_p, h2_p, h3_p = w1.shape[1], w2.shape[1], w3.shape[1]
    out_p = w4.shape[1]
    B = x.shape[0]

    # ---- batch (sublane) tiling -------------------------------------------
    b_pad = _round_up(B, SUBLANE)
    tm = min(block_m, b_pad)
    # v7x megacore: keep >= 2 grid steps whenever batch allows so the
    # "parallel" axis can shard across both TensorCores.
    if b_pad >= 2 * SUBLANE:
        tm = min(tm, b_pad // 2)
    tm = max(SUBLANE, (tm // SUBLANE) * SUBLANE)
    b_pad = _round_up(b_pad, tm)
    grid_m = b_pad // tm

    x_p = _pad_to(x, (b_pad, in_p))

    # ---- specs --------------------------------------------------------------
    # x / out are streamed per batch tile; weights & biases have a grid-
    # invariant index_map, stay VMEM-resident, and are single-buffered so they
    # don't occupy 2x VMEM on v7x's 64 MiB.
    def stream_spec(shape):
        if stream_buffers == 2:
            return pl.BlockSpec(shape, lambda i: (i, 0))
        return pl.BlockSpec(shape, lambda i: (i, 0),
                            pipeline_mode=pl.Buffered(buffer_count=stream_buffers))

    def resident_spec(arr):
        return pl.BlockSpec(arr.shape, lambda i: (0, 0),
                            pipeline_mode=pl.Buffered(buffer_count=1))

    flops = 2 * b_pad * (in_p * h1_p + h1_p * h2_p + h2_p * h3_p + h3_p * out_p)
    weight_bytes = sum(int(a.size) * a.dtype.itemsize for a in padded_params)
    bytes_accessed = (int(x_p.size) * x_p.dtype.itemsize
                      + weight_bytes
                      + b_pad * out_p * 4)

    out_padded = pl.pallas_call(
        fnn_kernel,
        out_shape=jax.ShapeDtypeStruct((b_pad, out_p), jnp.float32),
        grid=(grid_m,),
        in_specs=[
            stream_spec((tm, in_p)),
            resident_spec(w1), resident_spec(b1),
            resident_spec(w2), resident_spec(b2),
            resident_spec(w3), resident_spec(b3),
            resident_spec(w4), resident_spec(b4),
        ],
        out_specs=pl.BlockSpec((tm, out_p), lambda i: (i, 0)),
        compiler_params=pltpu.CompilerParams(
            dimension_semantics=("parallel",)),
        cost_estimate=pl.CostEstimate(
            flops=flops, transcendentals=0, bytes_accessed=bytes_accessed),
    )(x_p, w1, b1, w2, b2, w3, b3, w4, b4)

    return out_padded[:B, :out_size]


# --------------------------------------------------------------------------- #
# Reference / init
# --------------------------------------------------------------------------- #
def init_linear(key, fan_in, fan_out):
    # PyTorch nn.Linear default init: U(-1/sqrt(fan_in), 1/sqrt(fan_in))
    kw, kb = jax.random.split(key)
    bound = 1.0 / jnp.sqrt(fan_in)
    W = jax.random.uniform(kw, (fan_in, fan_out), jnp.float32, -bound, bound)
    b = jax.random.uniform(kb, (1, fan_out), jnp.float32, -bound, bound)
    return W, b


def reference_forward(x, params):
    h = x
    for i, (W, b) in enumerate(params):
        h = h @ W + b
        if i < len(params) - 1:
            h = jnp.maximum(h, 0.0)
    return h


if __name__ == "__main__":
    input_size, hidden1, hidden2, hidden3, output_size = 16, 32, 32, 32, 8
    batch = 64   # small, but enough to exercise grid_m >= 2 batch tiling

    key = jax.random.PRNGKey(0)
    kx, k1, k2, k3, k4 = jax.random.split(key, 5)

    x = jax.random.normal(kx, (batch, input_size), jnp.float32)
    params = [
        init_linear(k1, input_size, hidden1),
        init_linear(k2, hidden1, hidden2),
        init_linear(k3, hidden2, hidden3),
        init_linear(k4, hidden3, output_size),
    ]
    ref = reference_forward(x, params)

    # f32 MXU-operand path: exact validation against the reference.
    p_f32 = prepare_fnn_params(params, compute_dtype=jnp.float32)
    out_f32 = jax.block_until_ready(fnn_forward(x, p_f32, out_size=output_size))
    assert out_f32.shape == (batch, output_size)
    assert jnp.allclose(out_f32, ref, atol=1e-5, rtol=1e-5), "f32 mismatch vs reference"

    # bf16 MXU-operand path (v6e/v7x fast path): looser tolerance by design.
    p_bf16 = prepare_fnn_params(params, compute_dtype=jnp.bfloat16)
    out_bf16 = jax.block_until_ready(fnn_forward(x, p_bf16, out_size=output_size))
    assert out_bf16.shape == (batch, output_size)
    assert jnp.allclose(out_bf16, ref, atol=5e-2, rtol=5e-2), "bf16 mismatch vs reference"

    print("KERNEL_OK")
</pallas_src>

<mosaic_0001>
module attributes {stable_mosaic.version = 11 : i64} {
  func.func @fnn_kernel(%arg0: i32, %arg1: memref<32x128xf32, #tpu.memory_space<vmem>>, %arg2: memref<128x128xf32, #tpu.memory_space<vmem>>, %arg3: memref<1x128xf32, #tpu.memory_space<vmem>>, %arg4: memref<128x128xf32, #tpu.memory_space<vmem>>, %arg5: memref<1x128xf32, #tpu.memory_space<vmem>>, %arg6: memref<128x128xf32, #tpu.memory_space<vmem>>, %arg7: memref<1x128xf32, #tpu.memory_space<vmem>>, %arg8: memref<128x128xf32, #tpu.memory_space<vmem>>, %arg9: memref<1x128xf32, #tpu.memory_space<vmem>>, %arg10: memref<32x128xf32, #tpu.memory_space<vmem>>) attributes {dimension_semantics = [#tpu.dimension_semantics<parallel>], iteration_bounds = array<i64: 2>, scalar_prefetch = 0 : i64, scratch_operands = 0 : i64, tpu.core_type = #tpu.core_type<tc>, window_params = [{transform_indices = @transform_0, window_bounds = array<i64: 32, 128>}, {pipeline_mode = #tpu.pipeline_mode<synchronous>, transform_indices = @transform_1, window_bounds = array<i64: 128, 128>}, {pipeline_mode = #tpu.pipeline_mode<synchronous>, transform_indices = @transform_2, window_bounds = array<i64: 1, 128>}, {pipeline_mode = #tpu.pipeline_mode<synchronous>, transform_indices = @transform_3, window_bounds = array<i64: 128, 128>}, {pipeline_mode = #tpu.pipeline_mode<synchronous>, transform_indices = @transform_4, window_bounds = array<i64: 1, 128>}, {pipeline_mode = #tpu.pipeline_mode<synchronous>, transform_indices = @transform_5, window_bounds = array<i64: 128, 128>}, {pipeline_mode = #tpu.pipeline_mode<synchronous>, transform_indices = @transform_6, window_bounds = array<i64: 1, 128>}, {pipeline_mode = #tpu.pipeline_mode<synchronous>, transform_indices = @transform_7, window_bounds = array<i64: 128, 128>}, {pipeline_mode = #tpu.pipeline_mode<synchronous>, transform_indices = @transform_8, window_bounds = array<i64: 1, 128>}, {transform_indices = @transform_9, window_bounds = array<i64: 32, 128>}]} {
    %c0 = arith.constant 0 : index
    %c0_0 = arith.constant 0 : index
    %0 = vector.load %arg1[%c0, %c0_0] : memref<32x128xf32, #tpu.memory_space<vmem>>, vector<32x128xf32>
    %c0_1 = arith.constant 0 : index
    %c0_2 = arith.constant 0 : index
    %1 = vector.load %arg2[%c0_1, %c0_2] : memref<128x128xf32, #tpu.memory_space<vmem>>, vector<128x128xf32>
    %cst = arith.constant dense<0.000000e+00> : vector<32x128xf32>
    %2 = tpu.matmul %0, %1, %cst {dimension_numbers = #tpu.dot_dimension_numbers<[1], [0], [0], [1], [0, 0, 1, 1], [], []>} : vector<32x128xf32>, vector<128x128xf32>, vector<32x128xf32> -> vector<32x128xf32>
    %c0_3 = arith.constant 0 : index
    %c0_4 = arith.constant 0 : index
    %3 = vector.load %arg3[%c0_3, %c0_4] : memref<1x128xf32, #tpu.memory_space<vmem>>, vector<1x128xf32>
    %4 = vector.broadcast %3 : vector<1x128xf32> to vector<32x128xf32>
    %5 = arith.addf %2, %4 : vector<32x128xf32>
    %cst_5 = arith.constant 0.000000e+00 : f32
    %6 = vector.broadcast %cst_5 : f32 to vector<32x128xf32>
    %7 = arith.maximumf %5, %6 : vector<32x128xf32>
    %c0_6 = arith.constant 0 : index
    %c0_7 = arith.constant 0 : index
    %8 = vector.load %arg4[%c0_6, %c0_7] : memref<128x128xf32, #tpu.memory_space<vmem>>, vector<128x128xf32>
    %cst_8 = arith.constant dense<0.000000e+00> : vector<32x128xf32>
    %9 = tpu.matmul %7, %8, %cst_8 {dimension_numbers = #tpu.dot_dimension_numbers<[1], [0], [0], [1], [0, 0, 1, 1], [], []>} : vector<32x128xf32>, vector<128x128xf32>, vector<32x128xf32> -> vector<32x128xf32>
    %c0_9 = arith.constant 0 : index
    %c0_10 = arith.constant 0 : index
    %10 = vector.load %arg5[%c0_9, %c0_10] : memref<1x128xf32, #tpu.memory_space<vmem>>, vector<1x128xf32>
    %11 = vector.broadcast %10 : vector<1x128xf32> to vector<32x128xf32>
    %12 = arith.addf %9, %11 : vector<32x128xf32>
    %cst_11 = arith.constant 0.000000e+00 : f32
    %13 = vector.broadcast %cst_11 : f32 to vector<32x128xf32>
    %14 = arith.maximumf %12, %13 : vector<32x128xf32>
    %c0_12 = arith.constant 0 : index
    %c0_13 = arith.constant 0 : index
    %15 = vector.load %arg6[%c0_12, %c0_13] : memref<128x128xf32, #tpu.memory_space<vmem>>, vector<128x128xf32>
    %cst_14 = arith.constant dense<0.000000e+00> : vector<32x128xf32>
    %16 = tpu.matmul %14, %15, %cst_14 {dimension_numbers = #tpu.dot_dimension_numbers<[1], [0], [0], [1], [0, 0, 1, 1], [], []>} : vector<32x128xf32>, vector<128x128xf32>, vector<32x128xf32> -> vector<32x128xf32>
    %c0_15 = arith.constant 0 : index
    %c0_16 = arith.constant 0 : index
    %17 = vector.load %arg7[%c0_15, %c0_16] : memref<1x128xf32, #tpu.memory_space<vmem>>, vector<1x128xf32>
    %18 = vector.broadcast %17 : vector<1x128xf32> to vector<32x128xf32>
    %19 = arith.addf %16, %18 : vector<32x128xf32>
    %cst_17 = arith.constant 0.000000e+00 : f32
    %20 = vector.broadcast %cst_17 : f32 to vector<32x128xf32>
    %21 = arith.maximumf %19, %20 : vector<32x128xf32>
    %c0_18 = arith.constant 0 : index
    %c0_19 = arith.constant 0 : index
    %22 = vector.load %arg8[%c0_18, %c0_19] : memref<128x128xf32, #tpu.memory_space<vmem>>, vector<128x128xf32>
    %cst_20 = arith.constant dense<0.000000e+00> : vector<32x128xf32>
    %23 = tpu.matmul %21, %22, %cst_20 {dimension_numbers = #tpu.dot_dimension_numbers<[1], [0], [0], [1], [0, 0, 1, 1], [], []>} : vector<32x128xf32>, vector<128x128xf32>, vector<32x128xf32> -> vector<32x128xf32>
    %c0_21 = arith.constant 0 : index
    %c0_22 = arith.constant 0 : index
    %24 = vector.load %arg9[%c0_21, %c0_22] : memref<1x128xf32, #tpu.memory_space<vmem>>, vector<1x128xf32>
    %25 = vector.broadcast %24 : vector<1x128xf32> to vector<32x128xf32>
    %26 = arith.addf %23, %25 : vector<32x128xf32>
    %c0_23 = arith.constant 0 : index
    %c0_24 = arith.constant 0 : index
    %27 = vector.load %arg10[%c0_23, %c0_24] : memref<32x128xf32, #tpu.memory_space<vmem>>, vector<32x128xf32>
    tpu.vector_store %arg10[%c0_23, %c0_24], %26 {strides = array<i32>} : memref<32x128xf32, #tpu.memory_space<vmem>>, vector<32x128xf32>,
    return
  }
  func.func @transform_0(%arg0: i32) -> (i32, i32) {
    %c0_i32 = arith.constant 0 : i32
    %c0_i32_0 = arith.constant 0 : i32
    return %arg0, %c0_i32 : i32, i32
  }
  func.func @transform_1(%arg0: i32) -> (i32, i32) {
    %c0_i32 = arith.constant 0 : i32
    %c0_i32_0 = arith.constant 0 : i32
    %c0_i32_1 = arith.constant 0 : i32
    return %c0_i32, %c0_i32_0 : i32, i32
  }
  func.func @transform_2(%arg0: i32) -> (i32, i32) {
    %c0_i32 = arith.constant 0 : i32
    %c0_i32_0 = arith.constant 0 : i32
    %c0_i32_1 = arith.constant 0 : i32
    return %c0_i32, %c0_i32_0 : i32, i32
  }
  func.func @transform_3(%arg0: i32) -> (i32, i32) {
    %c0_i32 = arith.constant 0 : i32
    %c0_i32_0 = arith.constant 0 : i32
    %c0_i32_1 = arith.constant 0 : i32
    return %c0_i32, %c0_i32_0 : i32, i32
  }
  func.func @transform_4(%arg0: i32) -> (i32, i32) {
    %c0_i32 = arith.constant 0 : i32
    %c0_i32_0 = arith.constant 0 : i32
    %c0_i32_1 = arith.constant 0 : i32
    return %c0_i32, %c0_i32_0 : i32, i32
  }
  func.func @transform_5(%arg0: i32) -> (i32, i32) {
    %c0_i32 = arith.constant 0 : i32
    %c0_i32_0 = arith.constant 0 : i32
    %c0_i32_1 = arith.constant 0 : i32
    return %c0_i32, %c0_i32_0 : i32, i32
  }
  func.func @transform_6(%arg0: i32) -> (i32, i32) {
    %c0_i32 = arith.constant 0 : i32
    %c0_i32_0 = arith.constant 0 : i32
    %c0_i32_1 = arith.constant 0 : i32
    return %c0_i32, %c0_i32_0 : i32, i32
  }
  func.func @transform_7(%arg0: i32) -> (i32, i32) {
    %c0_i32 = arith.constant 0 : i32
    %c0_i32_0 = arith.constant 0 : i32
    %c0_i32_1 = arith.constant 0 : i32
    return %c0_i32, %c0_i32_0 : i32, i32
  }
  func.func @transform_8(%arg0: i32) -> (i32, i32) {
    %c0_i32 = arith.constant 0 : i32
    %c0_i32_0 = arith.constant 0 : i32
    %c0_i32_1 = arith.constant 0 : i32
    return %c0_i32, %c0_i32_0 : i32, i32
  }
  func.func @transform_9(%arg0: i32) -> (i32, i32) {
    %c0_i32 = arith.constant 0 : i32
    %c0_i32_0 = arith.constant 0 : i32
    return %arg0, %c0_i32 : i32, i32
  }
}

</mosaic_0001>

<bundles_post_ra>
// kernel: fnn_forward.1
= control target key start
LH: loop header
LB: loop body
LE: loop exit
PB: predicated region body
PF: predicated region fallthrough
CT: control target
= control target key end

     0   :  { %14 = vsyncpa [#allocation3], 0  ;;  %s1515_s0 = inlined_call_operand.vmem [shape: f32[64,128], index: 0, kind: input, shape index: {}]   ;;  %s1516_s1 = inlined_call_operand.vmem [shape: f32[128,128], index: 1, kind: input, shape index: {}]   ;;  %s1517_s2 = inlined_call_operand.vmem [shape: f32[1,128], index: 2, kind: input, shape index: {}]   ;;  %s1518_s3 = inlined_call_operand.hbm [shape: f32[128,128], index: 3, kind: input, shape index: {}]   ;;  %s1519_s4 = inlined_call_operand.vmem [shape: f32[1,128], index: 4, kind: input, shape index: {}]   ;;  %s1520_s5 = inlined_call_operand.hbm [shape: f32[128,128], index: 5, kind: input, shape index: {}]   ;;  %s1521_s6 = inlined_call_operand.vmem [shape: f32[1,128], index: 6, kind: input, shape index: {}]   ;;  %s1522_s7 = inlined_call_operand.hbm [shape: f32[128,128], index: 7, kind: input, shape index: {}]   ;;  %s1523_s8 = inlined_call_operand.vmem [shape: f32[1,128], index: 8, kind: input, shape index: {}]   ;;  %s1524_s9 = inlined_call_operand.vmem [shape: f32[64,128], index: 9, kind: output, shape index: {}]  }
   0x1   :  { %15 = vsyncpa [#allocation5], 0  ;;  %s1362_s30 = smov 0  }
   0x2 LB: > { %s919_s10 = sadd.s32 4294967295, %s1305_s30   ;;  %p921_p0 = scmp.ge.s32.totalorder %s1305_s30, 1  ;;  %s1305_s30 = sphi %s1362_s30, %s21_s30  }
   0x3   : > { %p246_p1 = scmp.lt.s32.totalorder %s1305_s30, 3  ;;  %p1372_p2 = scmp.eq.s32.totalorder %s919_s10, 0 }
   0x4   : > { %s1307_s13 = smov [#allocation4]   ;;  %s1308_s15 = smov [#allocation2]  }
   0x5   : > { %p1376_p3 = pnand %p921_p0, %p246_p1  ;;  %s280_s14 = sshll.u32 %s1307_s13, 4  ;;  %s281_s14 = int_to_ptr.vmem [resolvable:$true] %s280_s14 }
   0x6   : > { %s264_s16 = sshll.u32 %s1308_s15, 4  ;;  %s1309_s18 = smov [#allocation6]   ;;  %s265_s16 = int_to_ptr.vmem [resolvable:$true] %s264_s16 }
   0x7   : > { %p1184_p4 = pneg %p1376_p3  ;;  %s296_s19 = sshll.u32 %s1309_s18, 4  ;;  %s1388_s19 = int_to_ptr.vmem [resolvable:$true] %s296_s19 }
   0x8   : > { %s1224_s20 = scalar_lea.vmem %s281_s14, 2048  ;;  %p1232_p10 = scmp.lt.s32.totalorder %s281_s14, %s281_s14 }
   0x9   : > { %p1384_p5 = pnand %p1372_p2, %p1184_p4  ;;  %p1225_p7 = scmp.ne.s32.totalorder %s281_s14, %s1224_s20 }
   0xa   : > { %p1233_p11 = scmp.lt.s32.totalorder %s1224_s20, %s1224_s20 }
   0xb   : > { %p1215_p6 = pneg %p1384_p5 }
   0xc   : > { %p1234_p12 = por %p1233_p11, %p1232_p10 }
   0xd   : > { %p1227_p8 = pnand %p1225_p7, %p1215_p6 }
   0xf   : > { %p1228_p9 = pneg %p1227_p8 }
  0x11   : > { %p1235_p13 = pnand %p1234_p12, %p1228_p9 }
  0x13   : > { %1238 = shalt.err (!%p1235_p13)
}
  0x14   : > { %s1310_s21 = smov 128   ;;  %s1311_s22 = smov 8  }
  0x15   : > { %1190 = dma.hbm_to_vmem [thread:$0]  (!%p1384_p5), %s1520_s5, 2048, %s281_s14, [#allocation5], %s1310_s21, %s1310_s21, %s1311_s22  }
  0x16   : > { %s1250_s25 = scalar_lea.vmem %s265_s16, 2048  ;;  %p1258_p7 = scmp.lt.s32.totalorder %s265_s16, %s265_s16 }
  0x17   : > { %p1251_p0 = scmp.ne.s32.totalorder %s265_s16, %s1250_s25  ;;  %p1259_p8 = scmp.lt.s32.totalorder %s1250_s25, %s1250_s25 }
  0x19   : > { %p1253_p1 = pnand %p1251_p0, %p1215_p6  ;;  %p1260_p10 = por %p1259_p8, %p1258_p7 }
  0x1b   : > { %p1254_p4 = pneg %p1253_p1 }
  0x1d   : > { %p1261_p9 = pnand %p1260_p10, %p1254_p4 }
  0x1f   : > { %1264 = shalt.err (!%p1261_p9)
}
  0x20   : > { %1187 = dma.hbm_to_vmem [thread:$0]  (!%p1384_p5), %s1518_s3, 2048, %s265_s16, [#allocation3], %s1310_s21, %s1310_s21, %s1311_s22  }
  0x21   : > { %s1276_s28 = scalar_lea.vmem %s1388_s19, 2048  ;;  %p1284_p0 = scmp.lt.s32.totalorder %s1388_s19, %s1388_s19 }
  0x22   : > { %p1277_p11 = scmp.ne.s32.totalorder %s1388_s19, %s1276_s28  ;;  %p1285_p1 = scmp.lt.s32.totalorder %s1276_s28, %s1276_s28 }
  0x24   : > { %p1279_p12 = pnand %p1277_p11, %p1215_p6  ;;  %p1286_p4 = por %p1285_p1, %p1284_p0 }
  0x26   : > { %p1280_p13 = pneg %p1279_p12 }
  0x28   : > { %p1287_p7 = pnand %p1286_p4, %p1280_p13 }
  0x2a   : > { %1290 = shalt.err (!%p1287_p7)
}
  0x2b   : > { %1193 = dma.hbm_to_vmem [thread:$0]  (!%p1384_p5), %s1522_s7, 2048, %s1388_s19, [#allocation5], %s1310_s21, %s1310_s21, %s1311_s22  }
  0x2c   : > { %324 = sbr.rel (%p1376_p3) target bundleno = 887 (0x377), region = 56 }
  0x31   : > { %1296 = dma.done.wait (%p1372_p2), [#allocation3], 2048  }
  0x32   : > { %1298 = vsyncadd (%p1372_p2), [#allocation3], 4294965248 }
  0x33   : > { %1300 = dma.done.wait (%p1372_p2), [#allocation5], 4096  }
  0x34   : > { %1302 = vsyncadd (%p1372_p2), [#allocation5], 4294963200  ;;  %s930_s14 = sshll.u32 %s919_s10, 2  ;;  %v399_v0 = vld [vmem:[%s1516_s1 + $0x78] sm:$0xff]  ;;  %v398_v1 = vld [vmem:[%s1516_s1 + $0x70] sm:$0xff] }
  0x35   : > { %p369_p6 = scmp.lt.s32.totalorder %s930_s14, 7  ;;  %1020 = vmatprep.subr.mxu0 %v399_v0  ;;  %v397_v2 = vld [vmem:[%s1516_s1 + $0x68] sm:$0xff]  ;;  %v396_v3 = vld [vmem:[%s1516_s1 + $0x60] sm:$0xff]  ;;  %v395_v5 = vld [vmem:[%s1516_s1 + $0x58] sm:$0xff] }
  0x36   : > { %1021 = vmatpush3.msra.mxu0 %v399_v0  ;;  %v511_v6 = vld [vmem:[#allocation2 + $0x78] sm:$0xff]  ;;  %v510_v7 = vld [vmem:[#allocation2 + $0x70] sm:$0xff]  ;;  %v509_v9 = vld [vmem:[#allocation2 + $0x68] sm:$0xff] }
  0x37   : > { %s1529_s14 = smov (!%p369_p6, %s930_s14), 7  ;;  %1022 = vmatprep.subr.mxu0 %v398_v1  ;;  %1058 = vmatprep.subr.mxu1 %v511_v6  ;;  %v394_v8 = vld [vmem:[%s1516_s1 + $0x50] sm:$0xff]  ;;  %v393_v10 = vld [vmem:[%s1516_s1 + $0x48] sm:$0xff]  ;;  %v508_v11 = vld [vmem:[#allocation2 + $0x60] sm:$0xff] }
  0x38   : > { %s931_s12 = sshll.u32 %s1529_s14, 3  ;;  %1023 = vmatpush3.msra.mxu0 %v398_v1  ;;  %1059 = vmatpush3.msra.mxu1 %v511_v6  ;;  %v392_v12 = vld [vmem:[%s1516_s1 + $0x40] sm:$0xff]  ;;  %v507_v13 = vld [vmem:[#allocation2 + $0x58] sm:$0xff]  ;;  %v506_v15 = vld [vmem:[#allocation2 + $0x50] sm:$0xff] }
  0x39   : > { %s1450_s21 = scalar_lea.vmem %s1515_s0, %s931_s12  ;;  %1024 = vmatprep.subr.mxu0 %v397_v2  ;;  %1060 = vmatprep.subr.mxu1 %v510_v7  ;;  %v391_v14 = vld [vmem:[%s1516_s1 + $0x38] sm:$0xff]  ;;  %v390_v16 = vld [vmem:[%s1516_s1 + $0x30] sm:$0xff]  ;;  %v505_v17 = vld [vmem:[#allocation2 + $0x48] sm:$0xff]  ;;  %s378_s23 = scalar_lea.vmem %s1524_s9, %s931_s12 }
  0x3a   : > { %v380_v4 = vld [vmem:[%s1450_s21] sm:$0xff]  ;;  %1025 = vmatpush3.msra.mxu0 %v397_v2  ;;  %1061 = vmatpush3.msra.mxu1 %v510_v7  ;;  %v389_v18 = vld [vmem:[%s1516_s1 + $0x28] sm:$0xff]  ;;  %v503_v21 = vld [vmem:[#allocation2 + $0x38] sm:$0xff] }
  0x3b   : > { %1052 = vmatprep.mubr.f32.mxu0 %v380_v4  ;;  %1026 = vmatprep.subr.mxu0 %v396_v3  ;;  %v504_v19 = vld [vmem:[#allocation2 + $0x40] sm:$0xff]  ;;  %v387_v22 = vld [vmem:[%s1516_s1 + $0x18] sm:$0xff]  ;;  %v502_v23 = vld [vmem:[#allocation2 + $0x30] sm:$0xff] }
  0x3c   : > { %1027 = vmatpush3.msra.mxu0 %v396_v3  ;;  %1062 = vmatprep.subr.mxu1 %v509_v9  ;;  %v388_v20 = vld [vmem:[%s1516_s1 + $0x20] sm:$0xff]  ;;  %v386_v24 = vld [vmem:[%s1516_s1 + $0x10] sm:$0xff]  ;;  %v501_v25 = vld [vmem:[#allocation2 + $0x28] sm:$0xff] }
  0x3d   : > { %1028 = vmatprep.subr.mxu0 %v395_v5  ;;  %1063 = vmatpush3.msra.mxu1 %v509_v9  ;;  %v385_v26 = vld [vmem:[%s1516_s1 + $0x8] sm:$0xff]  ;;  %v500_v27 = vld [vmem:[#allocation2 + $0x20] sm:$0xff]  ;;  %v382_v30 = vld [vmem:[%s1450_s21 + $0x10] sm:$0xff] }
  0x3e   : > { %1029 = vmatpush3.msra.mxu0 %v395_v5  ;;  %1064 = vmatprep.subr.mxu1 %v508_v11  ;;  %v384_v28 = vld [vmem:[%s1516_s1] sm:$0xff]  ;;  %v381_v29 = vld [vmem:[%s1450_s21 + $0x8] sm:$0xff]  ;;  %v383_v31 = vld [vmem:[%s1450_s21 + $0x18] sm:$0xff] }
  0x3f   : > { %1030 = vmatprep.subr.mxu0 %v394_v8  ;;  %1065 = vmatpush3.msra.mxu1 %v508_v11  ;;  %v499_v32 = vld [vmem:[#allocation2 + $0x18] sm:$0xff]  ;;  %v498_v33 = vld [vmem:[#allocation2 + $0x10] sm:$0xff]  ;;  %v497_v34 = vld [vmem:[#allocation2 + $0x8] sm:$0xff] }
  0x40   : > { %1031 = vmatpush3.msra.mxu0 %v394_v8  ;;  %1066 = vmatprep.subr.mxu1 %v507_v13  ;;  %v496_v35 = vld [vmem:[#allocation2] sm:$0xff]  ;;  %v623_v36 = vld [vmem:[#allocation4 + $0x78] sm:$0xff]  ;;  %v622_v37 = vld [vmem:[#allocation4 + $0x70] sm:$0xff] }
  0x41   : > { %1032 = vmatprep.subr.mxu0 %v393_v10  ;;  %1067 = vmatpush3.msra.mxu1 %v507_v13  ;;  %v621_v38 = vld [vmem:[#allocation4 + $0x68] sm:$0xff]  ;;  %v620_v39 = vld [vmem:[#allocation4 + $0x60] sm:$0xff]  ;;  %v619_v40 = vld [vmem:[#allocation4 + $0x58] sm:$0xff] }
  0x42   : > { %1033 = vmatpush3.msra.mxu0 %v393_v10  ;;  %1068 = vmatprep.subr.mxu1 %v506_v15  ;;  %v618_v41 = vld [vmem:[#allocation4 + $0x50] sm:$0xff]  ;;  %v617_v42 = vld [vmem:[#allocation4 + $0x48] sm:$0xff]  ;;  %v616_v43 = vld [vmem:[#allocation4 + $0x40] sm:$0xff] }
  0x43   : > { %1034 = vmatprep.subr.mxu0 %v392_v12  ;;  %1069 = vmatpush3.msra.mxu1 %v506_v15  ;;  %v615_v44 = vld [vmem:[#allocation4 + $0x38] sm:$0xff]  ;;  %v614_v45 = vld [vmem:[#allocation4 + $0x30] sm:$0xff]  ;;  %v613_v46 = vld [vmem:[#allocation4 + $0x28] sm:$0xff] }
  0x44   : > { %1035 = vmatpush3.msra.mxu0 %v392_v12  ;;  %1070 = vmatprep.subr.mxu1 %v505_v17  ;;  %v612_v47 = vld [vmem:[#allocation4 + $0x20] sm:$0xff]  ;;  %v611_v61 = vld [vmem:[#allocation4 + $0x18] sm:$0xff]  ;;  %v610_v62 = vld [vmem:[#allocation4 + $0x10] sm:$0xff] }
  0x45   : > { %1036 = vmatprep.subr.mxu0 %v391_v14  ;;  %1071 = vmatpush3.msra.mxu1 %v505_v17  ;;  %v934_v48 = vld [vmem:[%s1517_s2] ss:$0 sm:$0xff]  ;;  %v609_v63 = vld [vmem:[#allocation4 + $0x8] sm:$0xff]  ;;  %v735_v1 = vld [vmem:[#allocation6 + $0x78] sm:$0xff] }
  0x46   : > { %1037 = vmatpush3.msra.mxu0 %v391_v14  ;;  %1072 = vmatprep.subr.mxu1 %v504_v19  ;;  %v608_v0 = vld [vmem:[#allocation4] sm:$0xff]  ;;  %v734_v2 = vld [vmem:[#allocation6 + $0x70] sm:$0xff]  ;;  %v733_v3 = vld [vmem:[#allocation6 + $0x68] sm:$0xff] }
  0x47   : > { %1038 = vmatprep.subr.mxu0 %v390_v16  ;;  %1073 = vmatpush3.msra.mxu1 %v504_v19  ;;  %v732_v4 = vld [vmem:[#allocation6 + $0x60] sm:$0xff]  ;;  %v731_v5 = vld [vmem:[#allocation6 + $0x58] sm:$0xff]  ;;  %v730_v6 = vld [vmem:[#allocation6 + $0x50] sm:$0xff] }
  0x48   : > { %1039 = vmatpush3.msra.mxu0 %v390_v16  ;;  %1074 = vmatprep.subr.mxu1 %v503_v21  ;;  %v729_v7 = vld [vmem:[#allocation6 + $0x48] sm:$0xff]  ;;  %v728_v8 = vld [vmem:[#allocation6 + $0x40] sm:$0xff]  ;;  %v727_v9 = vld [vmem:[#allocation6 + $0x38] sm:$0xff] }
  0x49   : > { %1040 = vmatprep.subr.mxu0 %v389_v18  ;;  %1075 = vmatpush3.msra.mxu1 %v503_v21  ;;  %v726_v10 = vld [vmem:[#allocation6 + $0x30] sm:$0xff]  ;;  %v725_v11 = vld [vmem:[#allocation6 + $0x28] sm:$0xff]  ;;  %v724_v12 = vld [vmem:[#allocation6 + $0x20] sm:$0xff] }
  0x4a   : > { %1041 = vmatpush3.msra.mxu0 %v389_v18  ;;  %1076 = vmatprep.subr.mxu1 %v502_v23  ;;  %v935_v13 = vld [vmem:[%s1519_s4] ss:$0 sm:$0xff] }
  0x4b   : > { %1042 = vmatprep.subr.mxu0 %v388_v20  ;;  %1077 = vmatpush3.msra.mxu1 %v502_v23 }
  0x4c   : > { %1043 = vmatpush3.msra.mxu0 %v388_v20  ;;  %1078 = vmatprep.subr.mxu1 %v501_v25 }
  0x4d   : > { %1044 = vmatprep.subr.mxu0 %v387_v22  ;;  %1079 = vmatpush3.msra.mxu1 %v501_v25 }
  0x4e   : > { %1045 = vmatpush3.msra.mxu0 %v387_v22  ;;  %1080 = vmatprep.subr.mxu1 %v500_v27 }
  0x4f   : > { %1046 = vmatprep.subr.mxu0 %v386_v24  ;;  %1081 = vmatpush3.msra.mxu1 %v500_v27  ;;  %v722_v27 = vld [vmem:[#allocation6 + $0x10] sm:$0xff] }
  0x50   : > { %1047 = vmatpush3.msra.mxu0 %v386_v24  ;;  %1082 = vmatprep.subr.mxu1 %v499_v32 }
  0x51   : > { %1048 = vmatprep.subr.mxu0 %v385_v26  ;;  %1083 = vmatpush3.msra.mxu1 %v499_v32 }
  0x52   : > { %1049 = vmatpush3.msra.mxu0 %v385_v26  ;;  %1084 = vmatprep.subr.mxu1 %v498_v33  ;;  %v723_v26 = vld [vmem:[#allocation6 + $0x18] sm:$0xff] }
  0x53   : > { %1050 = vmatprep.subr.mxu0 %v384_v28  ;;  %1085 = vmatpush3.msra.mxu1 %v498_v33 }
  0x54   : > { %1051 = vmatpush3.msra.mxu0 %v384_v28  ;;  %1086 = vmatprep.subr.mxu1 %v497_v34  ;;  %v721_v28 = vld [vmem:[#allocation6 + $0x8] sm:$0xff] }
  0x55   : > { %1053 = vmatmul.mubr.f32.vlgmr.msra.gmra.mxu0 %v381_v29  ;;  %1087 = vmatpush3.msra.mxu1 %v497_v34  ;;  %v720_v29 = vld [vmem:[#allocation6] sm:$0xff] }
  0x56   : > { %1055 = vmatprep.mubr.f32.mxu0 %v382_v30  ;;  %1088 = vmatprep.subr.mxu1 %v496_v35  ;;  %v936_v30 = vld [vmem:[%s1521_s6] ss:$0 sm:$0xff] }
  0x57   : > { %1089 = vmatpush3.msra.mxu1 %v496_v35  ;;  %1096 = vmatprep.subr.mxu0 %v623_v36 }
  0x58   : > { %1097 = vmatpush3.msra.mxu0 %v623_v36  ;;  %1134 = vmatprep.subr.mxu1 %v735_v1 }
  0x59   : > { %1056 = vmatmul.mubr.f32.gmra.mxu0 %v383_v31  ;;  %1098 = vmatprep.subr.mxu0 %v622_v37 }
  0x5a   : > { %1099 = vmatpush3.msra.mxu0 %v622_v37 }
  0x5b   : > { %1100 = vmatprep.subr.mxu0 %v621_v38 }
  0x5c   : > { %1101 = vmatpush3.msra.mxu0 %v621_v38 }
  0x5d   : > { %1102 = vmatprep.subr.mxu0 %v620_v39 }
  0x5e   : > { %1103 = vmatpush3.msra.mxu0 %v620_v39 }
  0x5f   : > { %1104 = vmatprep.subr.mxu0 %v619_v40 }
  0x60   : > { %1105 = vmatpush3.msra.mxu0 %v619_v40 }
  0x61   : > { %1106 = vmatprep.subr.mxu0 %v618_v41 }
  0x62   : > { %1107 = vmatpush3.msra.mxu0 %v618_v41 }
  0x63   : > { %1108 = vmatprep.subr.mxu0 %v617_v42 }
  0x64   : > { %1109 = vmatpush3.msra.mxu0 %v617_v42 }
  0x65   : > { %1110 = vmatprep.subr.mxu0 %v616_v43 }
  0x66   : > { %1111 = vmatpush3.msra.mxu0 %v616_v43 }
  0x67   : > { %1112 = vmatprep.subr.mxu0 %v615_v44 }
  0x68   : > { %1113 = vmatpush3.msra.mxu0 %v615_v44  ;;  %v937_v44 = vld [vmem:[%s1523_s8] ss:$0 sm:$0xff] }
  0x69   : > { %1114 = vmatprep.subr.mxu0 %v614_v45 }
  0x6a   : > { %1115 = vmatpush3.msra.mxu0 %v614_v45 }
  0x6b   : > { %1116 = vmatprep.subr.mxu0 %v613_v46 }
  0x6c   : > { %1117 = vmatpush3.msra.mxu0 %v613_v46 }
  0x6d   : > { %1118 = vmatprep.subr.mxu0 %v612_v47 }
  0x6e   : > { %1119 = vmatpush3.msra.mxu0 %v612_v47 }
  0x6f   : > { %1120 = vmatprep.subr.mxu0 %v611_v61 }
  0x70   : > { %1121 = vmatpush3.msra.mxu0 %v611_v61 }
  0x71   : > { %1122 = vmatprep.subr.mxu0 %v610_v62 }
  0x72   : > { %1123 = vmatpush3.msra.mxu0 %v610_v62 }
  0x73   : > { %1124 = vmatprep.subr.mxu0 %v609_v63 }
  0x74   : > { %1125 = vmatpush3.msra.mxu0 %v609_v63 }
  0x75   : > { %1126 = vmatprep.subr.mxu0 %v608_v0 }
  0x76   : > { %1127 = vmatpush3.msra.mxu0 %v608_v0 }
 0x115   : > { %v1054_v49 = vpop.f32.mrf.mxu0 }
 0x116   : > { %v479_v50 = vadd.f32 %v1054_v49, %v934_v48 }
 0x117   : > { %v473_v51 = vpop.f32.mrf.mxu0 }
 0x118   : > { %v474_v52 = vadd.f32 %v934_v48, %v473_v51  ;;  %v493_v55 = vmax.f32 %v479_v50, 0.0 }
 0x119   : > { %v1057_v53 = vpop.f32.mrf.mxu0 }
 0x11a   : > { %v492_v54 = vmax.f32 %v474_v52, 0.0  ;;  %v489_v56 = vadd.f32 %v1057_v53, %v934_v48 }
 0x11b   : > { %v483_v57 = vpop.f32.mrf.mxu0 }
 0x11c   : > { %v484_v58 = vadd.f32 %v934_v48, %v483_v57  ;;  %1090 = vmatprep.mubr.f32.mxu1 %v492_v54  ;;  %v495_v60 = vmax.f32 %v489_v56, 0.0 }
 0x11d   : > { %1091 = vmatmul.mubr.f32.vlgmr.msra.gmra.mxu1 %v493_v55 }
 0x11e   : > { %v494_v59 = vmax.f32 %v484_v58, 0.0  ;;  %1135 = vmatpush3.msra.mxu1 %v735_v1 }
 0x11f   : > { %1136 = vmatprep.subr.mxu1 %v734_v2 }
 0x120   : > { %1093 = vmatprep.mubr.f32.mxu1 %v494_v59  ;;  %1137 = vmatpush3.msra.mxu1 %v734_v2 }
 0x121   : > { %1094 = vmatmul.mubr.f32.gmra.mxu1 %v495_v60  ;;  %1138 = vmatprep.subr.mxu1 %v733_v3 }
 0x122   : > { %1139 = vmatpush3.msra.mxu1 %v733_v3 }
 0x123   : > { %1140 = vmatprep.subr.mxu1 %v732_v4 }
 0x124   : > { %1141 = vmatpush3.msra.mxu1 %v732_v4 }
 0x125   : > { %1142 = vmatprep.subr.mxu1 %v731_v5 }
 0x126   : > { %1143 = vmatpush3.msra.mxu1 %v731_v5 }
 0x127   : > { %1144 = vmatprep.subr.mxu1 %v730_v6 }
 0x128   : > { %1145 = vmatpush3.msra.mxu1 %v730_v6 }
 0x129   : > { %1146 = vmatprep.subr.mxu1 %v729_v7 }
 0x12a   : > { %1147 = vmatpush3.msra.mxu1 %v729_v7 }
 0x12b   : > { %1148 = vmatprep.subr.mxu1 %v728_v8 }
 0x12c   : > { %1149 = vmatpush3.msra.mxu1 %v728_v8 }
 0x12d   : > { %1150 = vmatprep.subr.mxu1 %v727_v9 }
 0x12e   : > { %1151 = vmatpush3.msra.mxu1 %v727_v9 }
 0x12f   : > { %1152 = vmatprep.subr.mxu1 %v726_v10 }
 0x130   : > { %1153 = vmatpush3.msra.mxu1 %v726_v10 }
 0x131   : > { %1154 = vmatprep.subr.mxu1 %v725_v11 }
 0x132   : > { %1155 = vmatpush3.msra.mxu1 %v725_v11 }
 0x133   : > { %1156 = vmatprep.subr.mxu1 %v724_v12 }
 0x134   : > { %1157 = vmatpush3.msra.mxu1 %v724_v12 }
 0x135   : > { %1158 = vmatprep.subr.mxu1 %v723_v26 }
 0x136   : > { %1159 = vmatpush3.msra.mxu1 %v723_v26 }
 0x137   : > { %1160 = vmatprep.subr.mxu1 %v722_v27 }
 0x138   : > { %1161 = vmatpush3.msra.mxu1 %v722_v27 }
 0x139   : > { %1162 = vmatprep.subr.mxu1 %v721_v28 }
 0x13a   : > { %1163 = vmatpush3.msra.mxu1 %v721_v28 }
 0x13b   : > { %1164 = vmatprep.subr.mxu1 %v720_v29 }
 0x13c   : > { %1165 = vmatpush3.msra.mxu1 %v720_v29 }
 0x1dd   : > { %v1092_v14 = vpop.f32.mrf.mxu1 }
 0x1de   : > { %v591_v15 = vadd.f32 %v1092_v14, %v935_v13 }
 0x1df   : > { %v585_v16 = vpop.f32.mrf.mxu1 }
 0x1e0   : > { %v586_v17 = vadd.f32 %v935_v13, %v585_v16  ;;  %v605_v20 = vmax.f32 %v591_v15, 0.0 }
 0x1e1   : > { %v1095_v18 = vpop.f32.mrf.mxu1 }
 0x1e2   : > { %v604_v19 = vmax.f32 %v586_v17, 0.0  ;;  %v601_v21 = vadd.f32 %v1095_v18, %v935_v13 }
 0x1e3   : > { %v595_v22 = vpop.f32.mrf.mxu1 }
 0x1e4   : > { %v596_v23 = vadd.f32 %v935_v13, %v595_v22  ;;  %1128 = vmatprep.mubr.f32.mxu0 %v604_v19  ;;  %v607_v25 = vmax.f32 %v601_v21, 0.0 }
 0x1e5   : > { %1129 = vmatmul.mubr.f32.vlgmr.msra.gmra.mxu0 %v605_v20 }
 0x1e6   : > { %v606_v24 = vmax.f32 %v596_v23, 0.0 }
 0x1e8   : > { %1131 = vmatprep.mubr.f32.mxu0 %v606_v24 }
 0x1e9   : > { %1132 = vmatmul.mubr.f32.gmra.mxu0 %v607_v25 }
 0x2a5   : > { %v1130_v31 = vpop.f32.mrf.mxu0 }
 0x2a6   : > { %v703_v32 = vadd.f32 %v1130_v31, %v936_v30 }
 0x2a7   : > { %v697_v33 = vpop.f32.mrf.mxu0 }
 0x2a8   : > { %v698_v34 = vadd.f32 %v936_v30, %v697_v33  ;;  %v717_v37 = vmax.f32 %v703_v32, 0.0 }
 0x2a9   : > { %v1133_v35 = vpop.f32.mrf.mxu0 }
 0x2aa   : > { %v716_v36 = vmax.f32 %v698_v34, 0.0  ;;  %v713_v38 = vadd.f32 %v1133_v35, %v936_v30 }
 0x2ab   : > { %v707_v39 = vpop.f32.mrf.mxu0 }
 0x2ac   : > { %v708_v40 = vadd.f32 %v936_v30, %v707_v39  ;;  %1166 = vmatprep.mubr.f32.mxu1 %v716_v36  ;;  %v719_v42 = vmax.f32 %v713_v38, 0.0 }
 0x2ad   : > { %1167 = vmatmul.mubr.f32.vlgmr.msra.gmra.mxu1 %v717_v37 }
 0x2ae   : > { %v718_v41 = vmax.f32 %v708_v40, 0.0 }
 0x2b0   : > { %1169 = vmatprep.mubr.f32.mxu1 %v718_v41 }
 0x2b1   : > { %1170 = vmatmul.mubr.f32.gmra.mxu1 %v719_v42 }
 0x36d   : > { %v1168_v43 = vpop.f32.mrf.mxu1 }
 0x36e   : > { %v815_v47 = vadd.f32 %v1168_v43, %v937_v44 }
 0x36f   : > { %v809_v45 = vpop.f32.mrf.mxu1 }
 0x370   : > { %v810_v46 = vadd.f32 %v937_v44, %v809_v45  ;;  %829 = vst [vmem:[%s378_s23 + $0x8] sm:$0xff] %v815_v47 }
 0x371   : > { %v1171_v48 = vpop.f32.mrf.mxu1 }
 0x372   : > { %828 = vst [vmem:[%s378_s23] sm:$0xff] %v810_v46  ;;  %v825_v51 = vadd.f32 %v1171_v48, %v937_v44 }
 0x373   : > { %v819_v49 = vpop.f32.mrf.mxu1 }
 0x374   : > { %v820_v50 = vadd.f32 %v937_v44, %v819_v49  ;;  %831 = vst [vmem:[%s378_s23 + $0x18] sm:$0xff] %v825_v51 }
 0x376   : > { %830 = vst [vmem:[%s378_s23 + $0x10] sm:$0xff] %v820_v50 }
 0x377 PF: > { %s21_s30 = sadd.s32 1, %s1305_s30  }
 0x378   : > { %p18_p2 = scmp.ge.s32.totalorder %s21_s30, 4  }
 0x37a   :  { %20 = sbr.rel (!%p18_p2) target bundleno = 2 (0x2), region = 99 }
 0x37f   :  { %854 = vsyncpa [#allocation3], 1 }
 0x380   :  { %856 = vsyncpa [#allocation3 + $0x1], 1 }
 0x381   :  { %857 = vsyncpa [#allocation5], 1 }

</bundles_post_ra>
